<compile_context>
chip_gen: v6e
topology: v6e:2x2x1
jax: 0.10.0
libtpu: 0.0.40
codegen_flags: <defaults>
</compile_context>

<pallas_src>
import math
import numpy as np

import jax
import jax.numpy as jnp
from jax.experimental import pallas as pl
from jax.experimental.pallas import tpu as pltpu

EMBED = 32
HEADS = 4
HEAD_DIM = EMBED // HEADS
SEQ = 8
BATCH = 2


def _softmax(x):
    m = jnp.max(x, axis=-1, keepdims=True)
    e = jnp.exp(x - m)
    return e * pl.reciprocal(jnp.sum(e, axis=-1, keepdims=True), approx=True)


def sparse_self_attn_kernel(q_ref, k_ref, v_ref,
                            wqkv_ref, bqkv_ref,
                            hm_ref, gm_ref, bmask_ref,
                            wh_ref, bh_ref,
                            out_ref):
    f32 = jnp.float32

    xq = q_ref[...]          # (BS, E)
    xk = k_ref[...]
    xv = v_ref[...]

    # Fused Q/K/V projections for both branches: (BS, E) @ (E, 2E) + (1, 2E).
    QQ = jnp.dot(xq, wqkv_ref[0], preferred_element_type=f32) + bqkv_ref[0]
    KK = jnp.dot(xk, wqkv_ref[1], preferred_element_type=f32) + bqkv_ref[1]
    VV = jnp.dot(xv, wqkv_ref[2], preferred_element_type=f32) + bqkv_ref[2]

    hm = hm_ref[...]         # (H, 2E)  per-head column selector (dynamic cols)
    gm = gm_ref[...]         # (1, 2E)  graph-branch column selector
    bmask = bmask_ref[...]   # (BS, BS) 0 within a batch, -1e9 across batches

    BS, E2 = QQ.shape
    H = hm.shape[0]
    E = q_ref.shape[-1]
    head_dim = E // H
    scale_d = 1.0 / math.sqrt(head_dim)
    scale_g = 1.0 / math.sqrt(E)

    # ---- DynamicSparseAttention branch (multi-head), batched over heads via
    #      column masking instead of lane slicing / concatenation. ----
    Qm = QQ[None, :, :] * hm[:, None, :]                     # (H, BS, 2E)
    Kb = jnp.broadcast_to(KK[None, :, :], (H, BS, E2))
    Vb = jnp.broadcast_to(VV[None, :, :], (H, BS, E2))
    s = jnp.einsum('hqe,hke->hqk', Qm, Kb,
                   preferred_element_type=f32) * scale_d
    s = s + bmask[None, :, :]
    # top_k=0, local_attention_window=None, mask=None, dropout=eval -> identity.
    p = _softmax(s)                                          # (H, BS, BS)
    o = jnp.einsum('hqk,hke->hqe', p, Vb,
                   preferred_element_type=f32)               # (H, BS, 2E)
    attn_d = jnp.sum(o * hm[:, None, :], axis=0)             # (BS, 2E); graph cols = 0

    # ---- GraphStructuredSparseAttention branch (single head). ----
    # graph_structure=None -> graph_sparse_attention is identity; dropout -> identity.
    Qg = QQ * gm
    sg = jnp.einsum('qe,ke->qk', Qg, KK,
                    preferred_element_type=f32) * scale_g + bmask
    pg = _softmax(sg)                                        # (BS, BS)
    og = jnp.dot(pg, VV, preferred_element_type=f32)         # (BS, 2E)

    # Combine branches (disjoint column ranges) and apply the pre-composed
    # (out-projection @ head) weights in a single matmul -> (BS, 2):
    #   column 0 = classification head, column 1 = regression head.
    attn = attn_d + og * gm
    out_ref[...] = jnp.dot(attn, wh_ref[...],
                           preferred_element_type=f32) + bh_ref[...]


def _full_spec(shape):
    n = len(shape)
    return pl.BlockSpec(shape, lambda i, _n=n: (0,) * _n)


def _prep_kernel_params(p):
    """Host-side weight fusion / pre-composition for the kernel."""
    E = p["Wd"].shape[1]
    # Fused projections: [dynamic | graph] along the output dim.
    Wqkv = jnp.stack([jnp.concatenate([p["Wd"][i], p["Wg"][i]], axis=1)
                      for i in range(3)])                     # (3, E, 2E)
    bqkv = jnp.stack([jnp.concatenate([p["bd"][i], p["bg"][i]], axis=1)
                      for i in range(3)])                     # (3, 1, 2E)

    # Pre-compose output projections with the cls/reg heads.
    Wcls_c = p["Wd"][3] @ p["Wcls"]                           # (E, 1)
    Wreg_c = p["Wg"][3] @ p["Wreg"]                           # (E, 1)
    zeros = jnp.zeros((E, 1), jnp.float32)
    W_heads = jnp.concatenate(
        [jnp.concatenate([Wcls_c, zeros], axis=0),            # acts on dynamic cols
         jnp.concatenate([zeros, Wreg_c], axis=0)], axis=1)   # acts on graph cols
    b_heads = jnp.concatenate(
        [p["bd"][3] @ p["Wcls"] + p["bcls"],
         p["bg"][3] @ p["Wreg"] + p["breg"]], axis=1)         # (1, 2)

    # Column masks.
    e_idx = jnp.arange(2 * E)
    h_idx = jnp.arange(HEADS)
    head_mask = (((e_idx[None, :] // HEAD_DIM) == h_idx[:, None])
                 & (e_idx[None, :] < E)).astype(jnp.float32)  # (H, 2E)
    gmask = (e_idx[None, :] >= E).astype(jnp.float32)         # (1, 2E)
    return Wqkv, bqkv, W_heads, b_heads, head_mask, gmask


def sparse_with_self_attention(q, k, v, params):
    B, S, E = q.shape
    BS = B * S

    Wqkv, bqkv, W_heads, b_heads, head_mask, gmask = _prep_kernel_params(params)

    # Additive mask that blocks attention across different batch elements.
    row_b = jnp.arange(BS) // S
    batch_mask = jnp.where(row_b[:, None] == row_b[None, :],
                           0.0, -1e9).astype(jnp.float32)     # (BS, BS)

    q2 = q.reshape(BS, E)
    k2 = k.reshape(BS, E)
    v2 = v.reshape(BS, E)

    # Single grid step: whole problem fits trivially in VMEM, so per-step
    # overhead dominates; one step is strictly best on v5e/v6e (single TC).
    # (pl.Buffered(1) is moot with a 1-step grid.)
    grid_spec = pltpu.PrefetchScalarGridSpec(
        num_scalar_prefetch=0,
        grid=(1,),
        in_specs=[_full_spec(q2.shape), _full_spec(k2.shape), _full_spec(v2.shape),
                  _full_spec(Wqkv.shape), _full_spec(bqkv.shape),
                  _full_spec(head_mask.shape), _full_spec(gmask.shape),
                  _full_spec(batch_mask.shape),
                  _full_spec(W_heads.shape), _full_spec(b_heads.shape)],
        out_specs=_full_spec((BS, 2)),
    )

    out = pl.pallas_call(
        sparse_self_attn_kernel,
        out_shape=jax.ShapeDtypeStruct((BS, 2), jnp.float32),
        grid_spec=grid_spec,
        compiler_params=pltpu.CompilerParams(dimension_semantics=("arbitrary",)),
    )(q2, k2, v2, Wqkv, bqkv, head_mask, gmask, batch_mask, W_heads, b_heads)

    cls = out[:, 0:1].reshape(B, S, 1)
    reg = out[:, 1:2].reshape(B, S, 1)
    return cls, reg


def init_params(key, E):
    keys = jax.random.split(key, 10)

    def lin(k, in_f, out_f):
        kw, kb = jax.random.split(k)
        W = jax.random.normal(kw, (in_f, out_f), jnp.float32) * 0.1
        b = jax.random.normal(kb, (out_f,), jnp.float32) * 0.1
        return W, b

    Wd, bd, Wg, bg = [], [], [], []
    for i in range(4):  # query_fc, key_fc, value_fc, out
        W, b = lin(keys[i], E, E)
        Wd.append(W); bd.append(b)
    for i in range(4):
        W, b = lin(keys[4 + i], E, E)
        Wg.append(W); bg.append(b)
    Wcls, bcls = lin(keys[8], E, 1)
    Wreg, breg = lin(keys[9], E, 1)
    # TODO(synk): GraphStructuredSparseAttention.edge_weight_fc is never used when
    # graph_structure=None, so its parameters are omitted.
    return dict(
        Wd=jnp.stack(Wd), bd=jnp.stack(bd)[:, None, :],   # (4,E,E), (4,1,E)
        Wg=jnp.stack(Wg), bg=jnp.stack(bg)[:, None, :],
        Wcls=Wcls, bcls=bcls.reshape(1, 1),
        Wreg=Wreg, breg=breg.reshape(1, 1),
    )


def ref_forward(q, k, v, p):
    """Pure-JAX reference of the PyTorch forward (eval mode, mask=None)."""
    hp = jax.lax.Precision.HIGHEST
    mm = lambda a, b: jnp.matmul(a, b, precision=hp)
    B, S, E = q.shape

    # dynamic sparse attention (multi-head)
    Q = mm(q, p["Wd"][0]) + p["bd"][0]
    K = mm(k, p["Wd"][1]) + p["bd"][1]
    V = mm(v, p["Wd"][2]) + p["bd"][2]
    Qh = Q.reshape(B, S, HEADS, HEAD_DIM).transpose(0, 2, 1, 3)
    Kh = K.reshape(B, S, HEADS, HEAD_DIM).transpose(0, 2, 1, 3)
    Vh = V.reshape(B, S, HEADS, HEAD_DIM).transpose(0, 2, 1, 3)
    s = jnp.einsum("bhqd,bhkd->bhqk", Qh, Kh, precision=hp) / math.sqrt(HEAD_DIM)
    pw = jax.nn.softmax(s, axis=-1)
    o = jnp.einsum("bhqk,bhkd->bhqd", pw, Vh, precision=hp)
    o = o.transpose(0, 2, 1, 3).reshape(B, S, E)
    out_d = mm(o, p["Wd"][3]) + p["bd"][3]
    cls = mm(out_d, p["Wcls"]) + p["bcls"]

    # graph structured attention (single head, scale sqrt(E))
    Qg = mm(q, p["Wg"][0]) + p["bg"][0]
    Kg = mm(k, p["Wg"][1]) + p["bg"][1]
    Vg = mm(v, p["Wg"][2]) + p["bg"][2]
    sg = jnp.einsum("bqe,bke->bqk", Qg, Kg, precision=hp) / math.sqrt(E)
    pg = jax.nn.softmax(sg, axis=-1)
    og = jnp.einsum("bqk,bke->bqe", pg, Vg, precision=hp)
    out_g = mm(og, p["Wg"][3]) + p["bg"][3]
    reg = mm(out_g, p["Wreg"]) + p["breg"]
    return cls, reg


if __name__ == "__main__":
    key = jax.random.PRNGKey(0)
    kq, kk, kv, kp = jax.random.split(key, 4)
    q = jax.random.normal(kq, (BATCH, SEQ, EMBED), jnp.float32)
    k = jax.random.normal(kk, (BATCH, SEQ, EMBED), jnp.float32)
    v = jax.random.normal(kv, (BATCH, SEQ, EMBED), jnp.float32)
    params = init_params(kp, EMBED)

    cls_out, reg_out = sparse_with_self_attention(q, k, v, params)
    jax.block_until_ready((cls_out, reg_out))

    assert cls_out.shape == (BATCH, SEQ, 1) and reg_out.shape == (BATCH, SEQ, 1)
    cls_ref, reg_ref = ref_forward(q, k, v, params)
    np.testing.assert_allclose(np.asarray(cls_out), np.asarray(cls_ref), atol=2e-2, rtol=2e-2)
    np.testing.assert_allclose(np.asarray(reg_out), np.asarray(reg_ref), atol=2e-2, rtol=2e-2)

    print("KERNEL_OK")
</pallas_src>

<mosaic_0001>
module attributes {stable_mosaic.version = 11 : i64} {
  func.func @sparse_self_attn_kernel(%arg0: i32, %arg1: memref<16x32xf32, #tpu.memory_space<vmem>>, %arg2: memref<16x32xf32, #tpu.memory_space<vmem>>, %arg3: memref<16x32xf32, #tpu.memory_space<vmem>>, %arg4: memref<3x32x64xf32, #tpu.memory_space<vmem>>, %arg5: memref<3x1x64xf32, #tpu.memory_space<vmem>>, %arg6: memref<4x64xf32, #tpu.memory_space<vmem>>, %arg7: memref<1x64xf32, #tpu.memory_space<vmem>>, %arg8: memref<16x16xf32, #tpu.memory_space<vmem>>, %arg9: memref<64x2xf32, #tpu.memory_space<vmem>>, %arg10: memref<1x2xf32, #tpu.memory_space<vmem>>, %arg11: memref<16x2xf32, #tpu.memory_space<vmem>>) attributes {dimension_semantics = [#tpu.dimension_semantics<arbitrary>], iteration_bounds = array<i64: 1>, scalar_prefetch = 0 : i64, scratch_operands = 0 : i64, tpu.core_type = #tpu.core_type<tc>, window_params = [{pipeline_mode = #tpu.pipeline_mode<synchronous>, transform_indices = @transform_0, window_bounds = array<i64: 16, 32>}, {pipeline_mode = #tpu.pipeline_mode<synchronous>, transform_indices = @transform_1, window_bounds = array<i64: 16, 32>}, {pipeline_mode = #tpu.pipeline_mode<synchronous>, transform_indices = @transform_2, window_bounds = array<i64: 16, 32>}, {pipeline_mode = #tpu.pipeline_mode<synchronous>, transform_indices = @transform_3, window_bounds = array<i64: 3, 32, 64>}, {pipeline_mode = #tpu.pipeline_mode<synchronous>, transform_indices = @transform_4, window_bounds = array<i64: 3, 1, 64>}, {pipeline_mode = #tpu.pipeline_mode<synchronous>, transform_indices = @transform_5, window_bounds = array<i64: 4, 64>}, {pipeline_mode = #tpu.pipeline_mode<synchronous>, transform_indices = @transform_6, window_bounds = array<i64: 1, 64>}, {pipeline_mode = #tpu.pipeline_mode<synchronous>, transform_indices = @transform_7, window_bounds = array<i64: 16, 16>}, {pipeline_mode = #tpu.pipeline_mode<synchronous>, transform_indices = @transform_8, window_bounds = array<i64: 64, 2>}, {pipeline_mode = #tpu.pipeline_mode<synchronous>, transform_indices = @transform_9, window_bounds = array<i64: 1, 2>}, {pipeline_mode = #tpu.pipeline_mode<synchronous>, transform_indices = @transform_10, window_bounds = array<i64: 16, 2>}]} {
    %c0 = arith.constant 0 : index
    %c0_0 = arith.constant 0 : index
    %0 = vector.load %arg1[%c0, %c0_0] : memref<16x32xf32, #tpu.memory_space<vmem>>, vector<16x32xf32>
    %c0_1 = arith.constant 0 : index
    %c0_2 = arith.constant 0 : index
    %1 = vector.load %arg2[%c0_1, %c0_2] : memref<16x32xf32, #tpu.memory_space<vmem>>, vector<16x32xf32>
    %c0_3 = arith.constant 0 : index
    %c0_4 = arith.constant 0 : index
    %2 = vector.load %arg3[%c0_3, %c0_4] : memref<16x32xf32, #tpu.memory_space<vmem>>, vector<16x32xf32>
    %c0_5 = arith.constant 0 : index
    %c0_6 = arith.constant 0 : index
    %c0_7 = arith.constant 0 : index
    %3 = vector.load %arg4[%c0_5, %c0_6, %c0_7] : memref<3x32x64xf32, #tpu.memory_space<vmem>>, vector<1x32x64xf32>
    %4 = vector.shape_cast %3 : vector<1x32x64xf32> to vector<32x64xf32>
    %cst = arith.constant dense<0.000000e+00> : vector<16x64xf32>
    %5 = tpu.matmul %0, %4, %cst {dimension_numbers = #tpu.dot_dimension_numbers<[1], [0], [0], [1], [0, 0, 1, 1], [], []>} : vector<16x32xf32>, vector<32x64xf32>, vector<16x64xf32> -> vector<16x64xf32>
    %c0_8 = arith.constant 0 : index
    %c0_9 = arith.constant 0 : index
    %c0_10 = arith.constant 0 : index
    %6 = vector.load %arg5[%c0_8, %c0_9, %c0_10] : memref<3x1x64xf32, #tpu.memory_space<vmem>>, vector<1x1x64xf32>
    %7 = vector.shape_cast %6 : vector<1x1x64xf32> to vector<1x64xf32>
    %8 = vector.broadcast %7 : vector<1x64xf32> to vector<16x64xf32>
    %9 = arith.addf %5, %8 : vector<16x64xf32>
    %c1 = arith.constant 1 : index
    %c0_11 = arith.constant 0 : index
    %c0_12 = arith.constant 0 : index
    %10 = vector.load %arg4[%c1, %c0_11, %c0_12] : memref<3x32x64xf32, #tpu.memory_space<vmem>>, vector<1x32x64xf32>
    %11 = vector.shape_cast %10 : vector<1x32x64xf32> to vector<32x64xf32>
    %cst_13 = arith.constant dense<0.000000e+00> : vector<16x64xf32>
    %12 = tpu.matmul %1, %11, %cst_13 {dimension_numbers = #tpu.dot_dimension_numbers<[1], [0], [0], [1], [0, 0, 1, 1], [], []>} : vector<16x32xf32>, vector<32x64xf32>, vector<16x64xf32> -> vector<16x64xf32>
    %c1_14 = arith.constant 1 : index
    %c0_15 = arith.constant 0 : index
    %c0_16 = arith.constant 0 : index
    %13 = vector.load %arg5[%c1_14, %c0_15, %c0_16] : memref<3x1x64xf32, #tpu.memory_space<vmem>>, vector<1x1x64xf32>
    %14 = vector.shape_cast %13 : vector<1x1x64xf32> to vector<1x64xf32>
    %15 = vector.broadcast %14 : vector<1x64xf32> to vector<16x64xf32>
    %16 = arith.addf %12, %15 : vector<16x64xf32>
    %c2 = arith.constant 2 : index
    %c0_17 = arith.constant 0 : index
    %c0_18 = arith.constant 0 : index
    %17 = vector.load %arg4[%c2, %c0_17, %c0_18] : memref<3x32x64xf32, #tpu.memory_space<vmem>>, vector<1x32x64xf32>
    %18 = vector.shape_cast %17 : vector<1x32x64xf32> to vector<32x64xf32>
    %cst_19 = arith.constant dense<0.000000e+00> : vector<16x64xf32>
    %19 = tpu.matmul %2, %18, %cst_19 {dimension_numbers = #tpu.dot_dimension_numbers<[1], [0], [0], [1], [0, 0, 1, 1], [], []>} : vector<16x32xf32>, vector<32x64xf32>, vector<16x64xf32> -> vector<16x64xf32>
    %c2_20 = arith.constant 2 : index
    %c0_21 = arith.constant 0 : index
    %c0_22 = arith.constant 0 : index
    %20 = vector.load %arg5[%c2_20, %c0_21, %c0_22] : memref<3x1x64xf32, #tpu.memory_space<vmem>>, vector<1x1x64xf32>
    %21 = vector.shape_cast %20 : vector<1x1x64xf32> to vector<1x64xf32>
    %22 = vector.broadcast %21 : vector<1x64xf32> to vector<16x64xf32>
    %23 = arith.addf %19, %22 : vector<16x64xf32>
    %c0_23 = arith.constant 0 : index
    %c0_24 = arith.constant 0 : index
    %24 = vector.load %arg6[%c0_23, %c0_24] : memref<4x64xf32, #tpu.memory_space<vmem>>, vector<4x64xf32>
    %c0_25 = arith.constant 0 : index
    %c0_26 = arith.constant 0 : index
    %25 = vector.load %arg7[%c0_25, %c0_26] : memref<1x64xf32, #tpu.memory_space<vmem>>, vector<1x64xf32>
    %c0_27 = arith.constant 0 : index
    %c0_28 = arith.constant 0 : index
    %26 = vector.load %arg8[%c0_27, %c0_28] : memref<16x16xf32, #tpu.memory_space<vmem>>, vector<16x16xf32>
    %27 = vector.shape_cast %9 : vector<16x64xf32> to vector<1x16x64xf32>
    %28 = vector.shape_cast %24 : vector<4x64xf32> to vector<4x1x64xf32>
    %29 = vector.broadcast %27 : vector<1x16x64xf32> to vector<4x16x64xf32>
    %30 = vector.broadcast %28 : vector<4x1x64xf32> to vector<4x16x64xf32>
    %31 = arith.mulf %29, %30 : vector<4x16x64xf32>
    %32 = vector.shape_cast %16 : vector<16x64xf32> to vector<1x16x64xf32>
    %33 = vector.shape_cast %32 : vector<1x16x64xf32> to vector<1x16x64xf32>
    %34 = vector.broadcast %33 : vector<1x16x64xf32> to vector<4x16x64xf32>
    %35 = vector.shape_cast %23 : vector<16x64xf32> to vector<1x16x64xf32>
    %36 = vector.shape_cast %35 : vector<1x16x64xf32> to vector<1x16x64xf32>
    %37 = vector.broadcast %36 : vector<1x16x64xf32> to vector<4x16x64xf32>
    "tpu.trace_start"() <{level = 10 : i32, message = "hqe,hke->hqk"}> : () -> ()
    %cst_29 = arith.constant dense<0.000000e+00> : vector<4x16x16xf32>
    %38 = tpu.matmul %31, %34, %cst_29 {dimension_numbers = #tpu.dot_dimension_numbers<[2], [2], [1], [1], [0, 0, 0, 1, 1, 1], [0], [0]>} : vector<4x16x64xf32>, vector<4x16x64xf32>, vector<4x16x16xf32> -> vector<4x16x16xf32>
    "tpu.trace_stop"() : () -> ()
    %cst_30 = arith.constant 0.353553385 : f32
    %39 = vector.broadcast %cst_30 : f32 to vector<4x16x16xf32>
    %40 = arith.mulf %38, %39 : vector<4x16x16xf32>
    %41 = vector.shape_cast %26 : vector<16x16xf32> to vector<1x16x16xf32>
    %42 = vector.broadcast %41 : vector<1x16x16xf32> to vector<4x16x16xf32>
    %43 = arith.addf %40, %42 : vector<4x16x16xf32>
    %cst_31 = arith.constant dense<0xFF800000> : vector<4x16xf32>
    %44 = vector.multi_reduction <maximumf>, %43, %cst_31 [2] : vector<4x16x16xf32> to vector<4x16xf32>
    %45 = vector.shape_cast %44 : vector<4x16xf32> to vector<4x16x1xf32>
    %46 = vector.broadcast %45 : vector<4x16x1xf32> to vector<4x16x16xf32>
    %47 = arith.subf %43, %46 : vector<4x16x16xf32>
    %48 = math.exp %47 : vector<4x16x16xf32>
    %cst_32 = arith.constant dense<0.000000e+00> : vector<4x16xf32>
    %49 = vector.multi_reduction <add>, %48, %cst_32 [2] : vector<4x16x16xf32> to vector<4x16xf32>
    %50 = vector.shape_cast %49 : vector<4x16xf32> to vector<4x16x1xf32>
    %51 = tpu.reciprocal %50 {approx = true} : vector<4x16x1xf32> -> vector<4x16x1xf32>
    %52 = vector.broadcast %51 : vector<4x16x1xf32> to vector<4x16x16xf32>
    %53 = arith.mulf %48, %52 : vector<4x16x16xf32>
    "tpu.trace_start"() <{level = 10 : i32, message = "hqk,hke->hqe"}> : () -> ()
    %cst_33 = arith.constant dense<0.000000e+00> : vector<4x16x64xf32>
    %54 = tpu.matmul %53, %37, %cst_33 {dimension_numbers = #tpu.dot_dimension_numbers<[2], [1], [1], [2], [0, 0, 0, 1, 1, 2], [0], [0]>} : vector<4x16x16xf32>, vector<4x16x64xf32>, vector<4x16x64xf32> -> vector<4x16x64xf32>
    "tpu.trace_stop"() : () -> ()
    %55 = vector.shape_cast %24 : vector<4x64xf32> to vector<4x1x64xf32>
    %56 = vector.broadcast %55 : vector<4x1x64xf32> to vector<4x16x64xf32>
    %57 = arith.mulf %54, %56 : vector<4x16x64xf32>
    %cst_34 = arith.constant dense<0.000000e+00> : vector<16x64xf32>
    %58 = vector.multi_reduction <add>, %57, %cst_34 [0] : vector<4x16x64xf32> to vector<16x64xf32>
    %59 = vector.broadcast %25 : vector<1x64xf32> to vector<16x64xf32>
    %60 = arith.mulf %9, %59 : vector<16x64xf32>
    "tpu.trace_start"() <{level = 10 : i32, message = "qe,ke->qk"}> : () -> ()
    %cst_35 = arith.constant dense<0.000000e+00> : vector<16x16xf32>
    %61 = tpu.matmul %60, %16, %cst_35 {dimension_numbers = #tpu.dot_dimension_numbers<[1], [1], [0], [0], [0, 0, 1, 0], [], []>} : vector<16x64xf32>, vector<16x64xf32>, vector<16x16xf32> -> vector<16x16xf32>
    "tpu.trace_stop"() : () -> ()
    %cst_36 = arith.constant 0.176776692 : f32
    %62 = vector.broadcast %cst_36 : f32 to vector<16x16xf32>
    %63 = arith.mulf %61, %62 : vector<16x16xf32>
    %64 = arith.addf %63, %26 : vector<16x16xf32>
    %cst_37 = arith.constant dense<0xFF800000> : vector<16xf32>
    %65 = vector.multi_reduction <maximumf>, %64, %cst_37 [1] : vector<16x16xf32> to vector<16xf32>
    %66 = vector.shape_cast %65 : vector<16xf32> to vector<16x1xf32>
    %67 = vector.broadcast %66 : vector<16x1xf32> to vector<16x16xf32>
    %68 = arith.subf %64, %67 : vector<16x16xf32>
    %69 = math.exp %68 : vector<16x16xf32>
    %cst_38 = arith.constant dense<0.000000e+00> : vector<16xf32>
    %70 = vector.multi_reduction <add>, %69, %cst_38 [1] : vector<16x16xf32> to vector<16xf32>
    %71 = vector.shape_cast %70 : vector<16xf32> to vector<16x1xf32>
    %72 = tpu.reciprocal %71 {approx = true} : vector<16x1xf32> -> vector<16x1xf32>
    %73 = vector.broadcast %72 : vector<16x1xf32> to vector<16x16xf32>
    %74 = arith.mulf %69, %73 : vector<16x16xf32>
    %cst_39 = arith.constant dense<0.000000e+00> : vector<16x64xf32>
    %75 = tpu.matmul %74, %23, %cst_39 {dimension_numbers = #tpu.dot_dimension_numbers<[1], [0], [0], [1], [0, 0, 1, 1], [], []>} : vector<16x16xf32>, vector<16x64xf32>, vector<16x64xf32> -> vector<16x64xf32>
    %76 = vector.broadcast %25 : vector<1x64xf32> to vector<16x64xf32>
    %77 = arith.mulf %75, %76 : vector<16x64xf32>
    %78 = arith.addf %58, %77 : vector<16x64xf32>
    %c0_40 = arith.constant 0 : index
    %c0_41 = arith.constant 0 : index
    %79 = vector.load %arg9[%c0_40, %c0_41] : memref<64x2xf32, #tpu.memory_space<vmem>>, vector<64x2xf32>
    %cst_42 = arith.constant dense<0.000000e+00> : vector<16x2xf32>
    %80 = tpu.matmul %78, %79, %cst_42 {dimension_numbers = #tpu.dot_dimension_numbers<[1], [0], [0], [1], [0, 0, 1, 1], [], []>} : vector<16x64xf32>, vector<64x2xf32>, vector<16x2xf32> -> vector<16x2xf32>
    %c0_43 = arith.constant 0 : index
    %c0_44 = arith.constant 0 : index
    %81 = vector.load %arg10[%c0_43, %c0_44] : memref<1x2xf32, #tpu.memory_space<vmem>>, vector<1x2xf32>
    %82 = vector.broadcast %81 : vector<1x2xf32> to vector<16x2xf32>
    %83 = arith.addf %80, %82 : vector<16x2xf32>
    %c0_45 = arith.constant 0 : index
    %c0_46 = arith.constant 0 : index
    %84 = vector.load %arg11[%c0_45, %c0_46] : memref<16x2xf32, #tpu.memory_space<vmem>>, vector<16x2xf32>
    tpu.vector_store %arg11[%c0_45, %c0_46], %83 {strides = array<i32>} : memref<16x2xf32, #tpu.memory_space<vmem>>, vector<16x2xf32>,
    return
  }
  func.func @transform_0(%arg0: i32) -> (i32, i32) {
    %c0_i32 = arith.constant 0 : i32
    %c0_i32_0 = arith.constant 0 : i32
    %c0_i32_1 = arith.constant 0 : i32
    return %c0_i32, %c0_i32_0 : i32, i32
  }
  func.func @transform_1(%arg0: i32) -> (i32, i32) {
    %c0_i32 = arith.constant 0 : i32
    %c0_i32_0 = arith.constant 0 : i32
    %c0_i32_1 = arith.constant 0 : i32
    return %c0_i32, %c0_i32_0 : i32, i32
  }
  func.func @transform_2(%arg0: i32) -> (i32, i32) {
    %c0_i32 = arith.constant 0 : i32
    %c0_i32_0 = arith.constant 0 : i32
    %c0_i32_1 = arith.constant 0 : i32
    return %c0_i32, %c0_i32_0 : i32, i32
  }
  func.func @transform_3(%arg0: i32) -> (i32, i32, i32) {
    %c0_i32 = arith.constant 0 : i32
    %c0_i32_0 = arith.constant 0 : i32
    %c0_i32_1 = arith.constant 0 : i32
    %c0_i32_2 = arith.constant 0 : i32
    return %c0_i32, %c0_i32_0, %c0_i32_1 : i32, i32, i32
  }
  func.func @transform_4(%arg0: i32) -> (i32, i32, i32) {
    %c0_i32 = arith.constant 0 : i32
    %c0_i32_0 = arith.constant 0 : i32
    %c0_i32_1 = arith.constant 0 : i32
    %c0_i32_2 = arith.constant 0 : i32
    return %c0_i32, %c0_i32_0, %c0_i32_1 : i32, i32, i32
  }
  func.func @transform_5(%arg0: i32) -> (i32, i32) {
    %c0_i32 = arith.constant 0 : i32
    %c0_i32_0 = arith.constant 0 : i32
    %c0_i32_1 = arith.constant 0 : i32
    return %c0_i32, %c0_i32_0 : i32, i32
  }
  func.func @transform_6(%arg0: i32) -> (i32, i32) {
    %c0_i32 = arith.constant 0 : i32
    %c0_i32_0 = arith.constant 0 : i32
    %c0_i32_1 = arith.constant 0 : i32
    return %c0_i32, %c0_i32_0 : i32, i32
  }
  func.func @transform_7(%arg0: i32) -> (i32, i32) {
    %c0_i32 = arith.constant 0 : i32
    %c0_i32_0 = arith.constant 0 : i32
    %c0_i32_1 = arith.constant 0 : i32
    return %c0_i32, %c0_i32_0 : i32, i32
  }
  func.func @transform_8(%arg0: i32) -> (i32, i32) {
    %c0_i32 = arith.constant 0 : i32
    %c0_i32_0 = arith.constant 0 : i32
    %c0_i32_1 = arith.constant 0 : i32
    return %c0_i32, %c0_i32_0 : i32, i32
  }
  func.func @transform_9(%arg0: i32) -> (i32, i32) {
    %c0_i32 = arith.constant 0 : i32
    %c0_i32_0 = arith.constant 0 : i32
    %c0_i32_1 = arith.constant 0 : i32
    return %c0_i32, %c0_i32_0 : i32, i32
  }
  func.func @transform_10(%arg0: i32) -> (i32, i32) {
    %c0_i32 = arith.constant 0 : i32
    %c0_i32_0 = arith.constant 0 : i32
    %c0_i32_1 = arith.constant 0 : i32
    return %c0_i32, %c0_i32_0 : i32, i32
  }
}

</mosaic_0001>

<bundles_post_ra>
// kernel: tpu_custom_call.1
= control target key start
LH: loop header
LB: loop body
LE: loop exit
PB: predicated region body
PF: predicated region fallthrough
CT: control target
= control target key end

     0   :  { %15 = vsyncpa [#allocation3], 0  ;;  %s1781_s13 = smov [#allocation2]   ;;  %s2115_s0 = inlined_call_operand.vmem [shape: f32[16,32], index: 0, kind: input, shape index: {}]   ;;  %s2116_s1 = inlined_call_operand.vmem [shape: f32[16,32], index: 1, kind: input, shape index: {}]   ;;  %s2117_s2 = inlined_call_operand.vmem [shape: f32[16,32], index: 2, kind: input, shape index: {}]   ;;  %s2118_s3 = inlined_call_operand.hbm [shape: f32[3,32,64], index: 3, kind: input, shape index: {}]   ;;  %s2119_s4 = inlined_call_operand.vmem [shape: f32[3,1,64], index: 4, kind: input, shape index: {}]   ;;  %s2120_s5 = inlined_call_operand.vmem [shape: f32[4,64], index: 5, kind: input, shape index: {}]   ;;  %s2121_s6 = inlined_call_operand.vmem [shape: f32[1,64], index: 6, kind: input, shape index: {}]   ;;  %s2122_s7 = inlined_call_operand.vmem [shape: f32[16,16], index: 7, kind: input, shape index: {}]   ;;  %s2123_s8 = inlined_call_operand.vmem [shape: f32[64,2], index: 8, kind: input, shape index: {}]   ;;  %s2124_s9 = inlined_call_operand.vmem [shape: f32[1,2], index: 9, kind: input, shape index: {}]   ;;  %s2125_s10 = inlined_call_operand.vmem [shape: f32[16,2], index: 10, kind: output, shape index: {}]  }
   0x1   :  { %s27_s14 = sshll.u32 %s1781_s13, 4  ;;  %s28_s14 = int_to_ptr.vmem [resolvable:$true] %s27_s14 }
   0x2   :  { %s1767_s15 = scalar_lea.vmem %s28_s14, 1536  ;;  %p1772_p1 = scmp.lt.s32.totalorder %s28_s14, %s28_s14 }
   0x3   :  { %p1768_p0 = scmp.ne.s32.totalorder %s28_s14, %s1767_s15  ;;  %p1773_p2 = scmp.lt.s32.totalorder %s1767_s15, %s1767_s15 }
   0x5   :  { %p1774_p3 = por %p1773_p2, %p1772_p1 }
   0x7   :  { %p1775_p4 = pnand %p1774_p3, %p1768_p0 }
   0x9   :  { %1778 = shalt.err (!%p1775_p4)
}
   0xa   :  { %s1782_s16 = smov 128   ;;  %s1783_s17 = smov 8  }
   0xb   :  { %33 = dma.hbm_to_vmem [thread:$0]  %s2118_s3, 1536, %s28_s14, [#allocation3], %s1782_s16, %s1782_s16, %s1783_s17  }
   0xc   :  { %1779 = dma.done.wait [#allocation3], 1536  }
   0xd   :  { %1780 = vsyncadd [#allocation3], 4294965760  ;;  %vm66_vm0 = vcmask 261120   ;;  %v58_v0 = vld [vmem:[#allocation2 + $0x18] sm:$0xff]  ;;  %v57_v1 = vld [vmem:[#allocation2 + $0x10] sm:$0xff]  ;;  %v352_v20 = vlaneseq  ;;  %vm393_vm1 = vcmask 523264  }
   0xe   :  { %1593 = vmatprep.subr.mxu0 %v58_v0  ;;  %v49_v2 = vld [vmem:[%s2115_s0] sm:$0xff]  ;;  %v56_v3 = vld [vmem:[#allocation2 + $0x8] sm:$0xff]  ;;  %v152_v6 = vld [vmem:[#allocation2 + $0x38] sm:$0xff]  ;;  %v1784_v18 = vmov 1966171168   ;;  %vm740_vm2 = vcmask 130048  }
   0xf   :  { %1594 = vmatpush3.msra.mxu0 %v58_v0  ;;  %1601 = vmatprep.mubr.msk.f32.mxu0 %vm66_vm0, %v49_v2  ;;  %v55_v4 = vld [vmem:[#allocation2] sm:$0xff]  ;;  %v50_v5 = vld [vmem:[%s2115_s0 + $0x8] sm:$0xff]  ;;  %v151_v8 = vld [vmem:[#allocation2 + $0x30] sm:$0xff]  ;;  %v350_v19 = vunpack.c.l.s4 %v1784_v18  ;;  %v353_v22 = vshrl.u32 %v352_v20, 7  ;;  %vm1471_vm3 = vcmask 15360  }
  0x10   :  { %1595 = vmatprep.subr.mxu0 %v57_v1  ;;  %v51_v7 = vld [vmem:[%s2116_s1] sm:$0xff]  ;;  %v150_v9 = vld [vmem:[#allocation2 + $0x28] sm:$0xff]  ;;  %v246_v12 = vld [vmem:[#allocation2 + $0x58] sm:$0xff] }
  0x11   :  { %1596 = vmatpush3.msra.mxu0 %v57_v1  ;;  %v149_v10 = vld [vmem:[#allocation2 + $0x20] sm:$0xff]  ;;  %v52_v11 = vld [vmem:[%s2116_s1 + $0x8] sm:$0xff]  ;;  %v245_v14 = vld [vmem:[#allocation2 + $0x50] sm:$0xff]  ;;  %v351_v21 = vunpack.c.0.s8 %v350_v19  ;;  %v367_v26 = vsub.s32 0, %v353_v22 }
  0x12   :  { %1597 = vmatprep.subr.mxu0 %v56_v3  ;;  %v53_v13 = vld [vmem:[%s2117_s2] sm:$0xff]  ;;  %v244_v15 = vld [vmem:[#allocation2 + $0x48] sm:$0xff] }
  0x13   :  { %1598 = vmatpush3.msra.mxu0 %v56_v3  ;;  %v243_v16 = vld [vmem:[#allocation2 + $0x40] sm:$0xff]  ;;  %v54_v17 = vld [vmem:[%s2117_s2 + $0x8] sm:$0xff]  ;;  %v354_v25 = vsub.s32 %v351_v21, %v353_v22 }
  0x14   :  { %1599 = vmatprep.subr.mxu0 %v55_v4  ;;  %v1490_v23 = vld.sshfl [vmem:[%s2120_s5] sm:$0x33 pattern:$0x75316420] }
  0x15   :  { %1600 = vmatpush3.msra.mxu0 %v55_v4  ;;  %v348_v24 = vcombine.high %v1490_v23, %v1490_v23  ;;  %v355_v27 = vrot.slane %v1490_v23, %v354_v25  ;;  %v1479_v30 = vld [vmem:[%s2119_s4] ss:$0 sm:$0xff]  ;;  %v1483_v37 = vld [vmem:[%s2119_s4 + $0x1] ss:$0 sm:$0xff]  ;;  %v1487_v52 = vld [vmem:[%s2119_s4 + $0x2] ss:$0 sm:$0xff] }
  0x16   :  { %1602 = vmatmul.mubr.msk.f32.vlgmr.msra.gmra.mxu0 %vm66_vm0, %v50_v5  ;;  %1604 = vmatprep.subr.mxu0 %v152_v6  ;;  %v1969_v1 = vld [vmem:[%s2122_s7] sm:$0xff]  ;;  %v1975_v4 = vld [vmem:[%s2122_s7 + $0x8] sm:$0xff] }
  0x17   :  { %1605 = vmatpush3.msra.mxu0 %v152_v6  ;;  %1612 = vmatprep.mubr.msk.f32.mxu0 %vm66_vm0, %v51_v7  ;;  %v362_v28 = vrot.slane %v348_v24, %v354_v25  ;;  %v1873_v31 = vrot.slane %v355_v27, %v367_v26  ;;  %v363_v40 = vcombine.high %v355_v27, %v355_v27 }
  0x18   :  { %1606 = vmatprep.subr.mxu0 %v151_v8 }
  0x19   :  { %1607 = vmatpush3.msra.mxu0 %v151_v8  ;;  %v1875_v32 = vrot.slane %v362_v28, %v367_v26  ;;  %v364_v43 = vcombine.high %v362_v28, %v362_v28  ;;  %v1906_v45 = vrot.slane %v363_v40, %v367_v26 }
  0x1a   :  { %1608 = vmatprep.subr.mxu0 %v150_v9 }
  0x1b   :  { %1609 = vmatpush3.msra.mxu0 %v150_v9  ;;  %v1908_v46 = vrot.slane %v364_v43, %v367_v26 }
  0x1c   :  { %1610 = vmatprep.subr.mxu0 %v149_v10 }
  0x1d   :  { %1611 = vmatpush3.msra.mxu0 %v149_v10 }
  0x1e   :  { %1613 = vmatmul.mubr.msk.f32.vlgmr.msra.gmra.mxu0 %vm66_vm0, %v52_v11  ;;  %1615 = vmatprep.subr.mxu0 %v246_v12 }
  0x1f   :  { %1616 = vmatpush3.msra.mxu0 %v246_v12  ;;  %1623 = vmatprep.mubr.msk.f32.mxu0 %vm66_vm0, %v53_v13 }
  0x20   :  { %1617 = vmatprep.subr.mxu0 %v245_v14 }
  0x21   :  { %1618 = vmatpush3.msra.mxu0 %v245_v14 }
  0x22   :  { %1619 = vmatprep.subr.mxu0 %v244_v15 }
  0x23   :  { %1620 = vmatpush3.msra.mxu0 %v244_v15 }
  0x24   :  { %1621 = vmatprep.subr.mxu0 %v243_v16 }
  0x25   :  { %1622 = vmatpush3.msra.mxu0 %v243_v16 }
  0x26   :  { %1624 = vmatmul.mubr.msk.f32.vlgmr.msra.gmra.mxu0 %vm66_vm0, %v54_v17 }
  0xd6   :  { %v1603_v29 = vpop.f32.mrf.mxu0 }
  0xd7   :  { %v1900_v44 = vadd.f32 %v1603_v29, %v1479_v30 }
  0xd8   :  { %v139_v33 = vpop.f32.mrf.mxu0 }
  0xd9   :  { %v1877_v34 = vadd.f32 %v1479_v30, %v139_v33  ;;  %v386_v47 = vmul.f32 %v1873_v31, %v1900_v44  ;;  %v388_v48 = vmul.f32 %v1875_v32, %v1900_v44  ;;  %v390_v55 = vmul.f32 %v1906_v45, %v1900_v44 }
  0xda   :  { %v392_v57 = vmul.f32 %v1908_v46, %v1900_v44 }
  0xdb   :  { %v385_v35 = vmul.f32 %v1873_v31, %v1877_v34  ;;  %v387_v36 = vmul.f32 %v1875_v32, %v1877_v34  ;;  %v389_v49 = vmul.f32 %v1906_v45, %v1877_v34  ;;  %v391_v50 = vmul.f32 %v1908_v46, %v1877_v34 }
  0xdd   :  { %1630 = vmatprep.mubr.msk.f32.mxu1 %vm393_vm1, %v385_v35  ;;  %1637 = vmatprep.mubr.msk.f32.mxu0 %vm393_vm1, %v387_v36 }
  0xde   :  { %v1614_v38 = vpop.f32.mrf.mxu0 }
  0xdf   :  { %v1888_v39 = vadd.f32 %v1614_v38, %v1483_v37 }
  0xe0   :  { %v233_v41 = vpop.f32.mrf.mxu0 }
  0xe1   :  { %v1890_v42 = vadd.f32 %v1483_v37, %v233_v41  ;;  %1626 = vmatprep.subr.msk.mxu1 %vm393_vm1, %v1888_v39  ;;  %1633 = vmatprep.subr.msk.mxu0 %vm393_vm1, %v1888_v39 }
  0xe2   :  { %1627 = vmatpush3.xpose.msk.msra.mxu1 %vm393_vm1, %v1888_v39  ;;  %1634 = vmatpush3.xpose.msk.msra.mxu0 %vm393_vm1, %v1888_v39 }
  0xe3   :  { %1628 = vmatprep.subr.msk.mxu1 %vm393_vm1, %v1890_v42  ;;  %1635 = vmatprep.subr.msk.mxu0 %vm393_vm1, %v1890_v42 }
  0xe6   :  { %1629 = vmatpush3.xpose.msk.msra.mxu1 %vm393_vm1, %v1890_v42  ;;  %1636 = vmatpush3.xpose.msk.msra.mxu0 %vm393_vm1, %v1890_v42  ;;  %v1625_v51 = vpop.f32.mrf.mxu0 }
  0xe7   :  { %1640 = vmatprep.subr.msk.mxu1 %vm393_vm1, %v1888_v39  ;;  %1647 = vmatprep.subr.msk.mxu0 %vm393_vm1, %v1888_v39  ;;  %v1941_v53 = vadd.f32 %v1625_v51, %v1487_v52 }
  0xe8   :  { %v327_v54 = vpop.f32.mrf.mxu0 }
  0xe9   :  { %1631 = vmatmul.mubr.msk.f32.vlgmr.msra.gmra.mxu1 %vm393_vm1, %v386_v47  ;;  %1638 = vmatmul.mubr.msk.f32.vlgmr.msra.gmra.mxu0 %vm393_vm1, %v388_v48  ;;  %v1950_v56 = vadd.f32 %v1487_v52, %v327_v54 }
  0xea   :  { %1641 = vmatpush3.xpose.msk.msra.mxu1 %vm393_vm1, %v1888_v39  ;;  %1644 = vmatprep.mubr.msk.f32.mxu1 %vm393_vm1, %v389_v49 }
  0xeb   :  { %1648 = vmatpush3.xpose.msk.msra.mxu0 %vm393_vm1, %v1888_v39  ;;  %1651 = vmatprep.mubr.msk.f32.mxu0 %vm393_vm1, %v391_v50  ;;  %v2007_v50 = vld [vmem:[%s2121_s6] ss:$0 sm:$0xff] }
  0xec   :  { %1642 = vmatprep.subr.msk.mxu1 %vm393_vm1, %v1890_v42  ;;  %1649 = vmatprep.subr.msk.mxu0 %vm393_vm1, %v1890_v42  ;;  %v1181_v54 = vmul.f32 %v2007_v50, %v1877_v34 }
  0xee   :  { %1643 = vmatpush3.xpose.msk.msra.mxu1 %vm393_vm1, %v1890_v42 }
  0xef   :  { %1650 = vmatpush3.xpose.msk.msra.mxu0 %vm393_vm1, %v1890_v42  ;;  %1654 = vmatprep.subr.mxu1 %v1941_v53 }
  0xf0   :  { %1668 = vmatprep.subr.mxu0 %v1941_v53 }
  0xf1   :  { %1645 = vmatmul.mubr.msk.f32.vlgmr.msra.gmra.mxu1 %vm393_vm1, %v390_v55  ;;  %v1182_v55 = vmul.f32 %v2007_v50, %v1900_v44 }
  0xf2   :  { %1652 = vmatmul.mubr.msk.f32.vlgmr.msra.gmra.mxu0 %vm393_vm1, %v392_v57  ;;  %1655 = vmatpush3.msra.mxu1 %v1941_v53 }
  0xf3   :  { %1669 = vmatpush3.msra.mxu0 %v1941_v53  ;;  %1656 = vmatprep.subr.mxu1 %v1950_v56 }
  0xf4   :  { %1670 = vmatprep.subr.mxu0 %v1950_v56  ;;  %1657 = vmatpush3.msra.mxu1 %v1950_v56 }
  0xf5   :  { %1671 = vmatpush3.msra.mxu0 %v1950_v56  ;;  %1661 = vmatprep.subr.mxu1 %v1941_v53 }
  0xf6   :  { %1682 = vmatprep.subr.msk.mxu0 %vm393_vm1, %v1888_v39 }
 0x1a9   :  { %v1632_v58 = vpop.f32.mrf.mxu1  ;;  %v1639_v61 = vpop.f32.mrf.mxu0 }
 0x1aa   :  { %v725_v26 = vmul.f32 0.35355338, %v1632_v58  ;;  %v727_v29 = vmul.f32 0.35355338, %v1639_v61 }
 0x1ab   :  { %v472_v59 = vpop.f32.mrf.mxu1  ;;  %v553_v3 = vpop.f32.mrf.mxu0 }
 0x1ac   :  { %v724_v5 = vmul.f32 0.35355338, %v472_v59  ;;  %v726_v9 = vmul.f32 0.35355338, %v553_v3  ;;  %v733_v33 = vadd.f32 %v725_v26, %v1975_v4  ;;  %v735_v37 = vadd.f32 %v727_v29, %v1975_v4 }
 0x1ae   :  { %v1981_v11 = vadd.f32 %v724_v5, %v1969_v1  ;;  %v1986_v15 = vadd.f32 %v726_v9, %v1969_v1  ;;  %v744_v36 = vsel %vm740_vm2, %v733_v33, -inf  ;;  %v750_v38 = vsel %vm740_vm2, %v735_v37, -inf }
 0x1b0   :  { %v741_v14 = vsel %vm740_vm2, %v1981_v11, -inf  ;;  %v747_v16 = vsel %vm740_vm2, %v1986_v15, -inf }
 0x1b1   :  { %v1646_v60 = vpop.f32.mrf.mxu1 }
 0x1b2   :  { %v729_v63 = vmul.f32 0.35355338, %v1646_v60  ;;  %v1653_v8 = vpop.f32.mrf.mxu0 }
 0x1b3   :  { %v634_v62 = vpop.f32.mrf.mxu1  ;;  %v731_v35 = vmul.f32 0.35355338, %v1653_v8 }
 0x1b4   :  { %v728_v0 = vmul.f32 0.35355338, %v634_v62  ;;  %v737_v7 = vadd.f32 %v729_v63, %v1975_v4  ;;  %v715_v12 = vpop.f32.mrf.mxu0 }
 0x1b5   :  { %v730_v13 = vmul.f32 0.35355338, %v715_v12  ;;  %v739_v40 = vadd.f32 %v731_v35, %v1975_v4 }
 0x1b6   :  { %v736_v2 = vadd.f32 %v728_v0, %v1969_v1  ;;  %v756_v10 = vsel %vm740_vm2, %v737_v7, -inf }
 0x1b7   :  { %v1991_v17 = vadd.f32 %v730_v13, %v1969_v1  ;;  %v762_v41 = vsel %vm740_vm2, %v739_v40, -inf }
 0x1b8   :  { %v753_v6 = vsel %vm740_vm2, %v736_v2, -inf }
 0x1b9   :  { %754 = vmax.xlane.f32.xlu0 %v753_v6  ;;  %v759_v18 = vsel %vm740_vm2, %v1991_v17, -inf }
 0x1bd   :  { %757 = vmax.xlane.f32.xlu0 %v756_v10 }
 0x1c1   :  { %742 = vmax.xlane.f32.xlu0 %v741_v14 }
 0x1c5   :  { %748 = vmax.xlane.f32.xlu0 %v747_v16 }
 0x1c9   :  { %760 = vmax.xlane.f32.xlu0 %v759_v18 }
 0x242   :  { %v755_v19 = vpop.xlane.xlu0 %754 }
 0x243   :  { %v769_v20 = vsub.f32 %v736_v2, %v755_v19 }
 0x245   :  { %v781_v21 = vmul.f32 1.442695, %v769_v20 }
 0x246   :  { %v758_v22 = vpop.xlane.xlu0 %757 }
 0x247   :  { %1719 = vpow2.f32 %v781_v21  ;;  %v770_v23 = vsub.f32 %v737_v7, %v758_v22 }
 0x249   :  { %v783_v24 = vmul.f32 1.442695, %v770_v23 }
 0x24a   :  { %v743_v34 = vpop.xlane.xlu0 %742 }
 0x24b   :  { %1721 = vpow2.f32 %v783_v24 }
 0x24e   :  { %v749_v60 = vpop.xlane.xlu0 %748 }
 0x24f   :  { %v767_v2 = vsub.f32 %v1986_v15, %v749_v60 }
 0x251   :  { %v777_v6 = vmul.f32 1.442695, %v767_v2 }
 0x252   :  { %v761_v3 = vpop.xlane.xlu0 %760 }
 0x253   :  { %v771_v7 = vsub.f32 %v1991_v17, %v761_v3  ;;  %v1382_v3 = vld [vmem:[%s2123_s8 + $0x38] sm:$0xff] }
 0x254   :  { %v1720_v25 = vpop.eup %1719 }
 0x255   :  { %v801_v27 = vsel %vm740_vm2, %v1720_v25, 0.0  ;;  %v785_v10 = vmul.f32 1.442695, %v771_v7 }
 0x256   :  { %802 = vadd.xlane.f32.xlu1 %v801_v27 }
 0x258   :  { %v1722_v28 = vpop.eup %1721 }
 0x259   :  { %v804_v30 = vsel %vm740_vm2, %v1722_v28, 0.0 }
 0x25a   :  { %805 = vadd.xlane.f32.xlu1 %v804_v30 }
 0x25e   :  { %745 = vmax.xlane.f32.xlu1 %v744_v36 }
 0x262   :  { %751 = vmax.xlane.f32.xlu1 %v750_v38 }
 0x266   :  { %763 = vmax.xlane.f32.xlu1 %v762_v41 }
 0x2df   :  { %v803_v43 = vpop.xlane.xlu1 %802 }
 0x2e0   :  { %1723 = vrcp.f32 %v803_v43 }
 0x2e3   :  { %v806_v47 = vpop.xlane.xlu1 %805 }
 0x2e4   :  { %1725 = vrcp.f32 %v806_v47 }
 0x2e7   :  { %v746_v57 = vpop.xlane.xlu1 %745 }
 0x2e8   :  { %v766_v59 = vsub.f32 %v733_v33, %v746_v57 }
 0x2ea   :  { %v775_v61 = vmul.f32 1.442695, %v766_v59 }
 0x2eb   :  { %v752_v58 = vpop.xlane.xlu1 %751 }
 0x2ec   :  { %v768_v62 = vsub.f32 %v735_v37, %v752_v58  ;;  %1727 = vpow2.f32 %v775_v61 }
 0x2ed   :  { %v1724_v48 = vpop.eup %1723 }
 0x2ee   :  { %v825_v49 = vmul.f32 %v1724_v48, %v1720_v25 }
 0x2ef   :  { %v764_v63 = vpop.xlane.xlu1 %763 }
 0x2f0   :  { %1672 = vmatprep.mubr.msk.f32.mxu0 %vm740_vm2, %v825_v49  ;;  %v772_v5 = vsub.f32 %v739_v40, %v764_v63 }
 0x2f1   :  { %v1726_v51 = vpop.eup %1725 }
 0x2f2   :  { %v826_v52 = vmul.f32 %v1726_v51, %v1722_v28  ;;  %v787_v8 = vmul.f32 1.442695, %v772_v5 }
 0x2f4   :  { %1673 = vmatmul.mubr.msk.f32.vlgmr.msra.gmra.mxu0 %vm740_vm2, %v826_v52 }
 0x2f5   :  { %1683 = vmatpush3.xpose.msk.msra.mxu0 %vm393_vm1, %v1888_v39  ;;  %1686 = vmatprep.mubr.msk.f32.mxu0 %vm393_vm1, %v1181_v54  ;;  %v765_v39 = vsub.f32 %v1981_v11, %v743_v34 }
 0x2f6   :  { %1684 = vmatprep.subr.msk.mxu0 %vm393_vm1, %v1890_v42 }
 0x2f7   :  { %v773_v0 = vmul.f32 1.442695, %v765_v39 }
 0x2f9   :  { %1685 = vmatpush3.xpose.msk.msra.mxu0 %vm393_vm1, %v1890_v42  ;;  %v779_v42 = vmul.f32 1.442695, %v768_v62  ;;  %1729 = vpow2.f32 %v773_v0  ;;  %v1728_v19 = vpop.eup %1727 }
 0x2fa   :  { %v792_v21 = vsel %vm740_vm2, %v1728_v19, 0.0 }
 0x2fb   :  { %1731 = vpow2.f32 %v779_v42 }
 0x2fc   :  { %1687 = vmatmul.mubr.msk.f32.vlgmr.msra.gmra.mxu0 %vm393_vm1, %v1182_v55  ;;  %1733 = vpow2.f32 %v777_v6 }
 0x2fd   :  { %1735 = vpow2.f32 %v787_v8 }
 0x2fe   :  { %1737 = vpow2.f32 %v785_v10 }
 0x306   :  { %v1730_v20 = vpop.eup %1729 }
 0x307   :  { %v789_v23 = vsel %vm740_vm2, %v1730_v20, 0.0 }
 0x308   :  { %v1732_v22 = vpop.eup %1731 }
 0x309   :  { %v1734_v24 = vpop.eup %1733 }
 0x30a   :  { %v1736_v25 = vpop.eup %1735 }
 0x30b   :  { %v1738_v26 = vpop.eup %1737  ;;  %v810_v27 = vsel %vm740_vm2, %v1736_v25, 0.0 }
 0x30c   :  { %v807_v28 = vsel %vm740_vm2, %v1738_v26, 0.0 }
 0x3b4   :  { %v2024_v44 = vpop.f32.mrf.mxu0 }
 0x3b6   :  { %v2027_v9 = vpop.f32.mrf.mxu0 }
 0x3bc   :  { %v1688_v11 = vpop.f32.mrf.mxu0 }
 0x3bd   :  { %v1265_v12 = vmul.f32 0.17677669, %v1688_v11  ;;  %v1379_v11 = vld [vmem:[%s2123_s8 + $0x20] sm:$0xff] }
 0x3be   :  { %v1255_v13 = vpop.f32.mrf.mxu0 }
 0x3bf   :  { %v1264_v14 = vmul.f32 0.17677669, %v1255_v13  ;;  %v1267_v15 = vadd.f32 %v1265_v12, %v1975_v4  ;;  %v798_v4 = vsel %vm740_vm2, %v1732_v22, 0.0  ;;  %v1378_v12 = vld [vmem:[%s2123_s8 + $0x18] sm:$0xff]  ;;  %v1377_v13 = vld [vmem:[%s2123_s8 + $0x10] sm:$0xff] }
 0x3c1   :  { %v1266_v16 = vadd.f32 %v1264_v14, %v1969_v1  ;;  %v1271_v18 = vsel %vm740_vm2, %v1267_v15, -inf  ;;  %v795_v1 = vsel %vm740_vm2, %v1734_v24, 0.0  ;;  %v1376_v14 = vld [vmem:[%s2123_s8 + $0x8] sm:$0xff] }
 0x3c2   :  { %1272 = vmax.xlane.f32.xlu1 %v1271_v18 }
 0x3c3   :  { %v1268_v17 = vsel %vm740_vm2, %v1266_v16, -inf }
 0x3c4   :  { %1269 = vmax.xlane.f32.xlu0 %v1268_v17 }
 0x3c6   :  { %793 = vadd.xlane.f32.xlu1 %v792_v21 }
 0x3c8   :  { %790 = vadd.xlane.f32.xlu0 %v789_v23 }
 0x3ca   :  { %799 = vadd.xlane.f32.xlu1 %v798_v4 }
 0x3cc   :  { %796 = vadd.xlane.f32.xlu0 %v795_v1 }
 0x3ce   :  { %811 = vadd.xlane.f32.xlu1 %v810_v27 }
 0x3d0   :  { %808 = vadd.xlane.f32.xlu0 %v807_v28  ;;  %v1158_v28 = vmul.f32 %v2024_v44, %v1906_v45 }
 0x44b   :  { %v1273_v29 = vpop.xlane.xlu1 %1272 }
 0x44c   :  { %v1275_v30 = vsub.f32 %v1267_v15, %v1273_v29  ;;  %v1375_v15 = vld [vmem:[%s2123_s8] sm:$0xff] }
 0x44d   :  { %v1270_v33 = vpop.xlane.xlu0 %1269 }
 0x44e   :  { %v1278_v35 = vmul.f32 1.442695, %v1275_v30  ;;  %v1274_v36 = vsub.f32 %v1266_v16, %v1270_v33 }
 0x44f   :  { %v794_v37 = vpop.xlane.xlu1 %793 }
 0x450   :  { %1739 = vpow2.f32 %v1278_v35  ;;  %v1276_v38 = vmul.f32 1.442695, %v1274_v36  ;;  %v1171_v36 = vsel %vm393_vm1, %v1158_v28, 0.0 }
 0x451   :  { %1741 = vrcp.f32 %v794_v37  ;;  %v791_v40 = vpop.xlane.xlu0 %790 }
 0x452   :  { %1743 = vpow2.f32 %v1276_v38 }
 0x453   :  { %1745 = vrcp.f32 %v791_v40  ;;  %v800_v41 = vpop.xlane.xlu1 %799 }
 0x454   :  { %1747 = vrcp.f32 %v800_v41 }
 0x455   :  { %v797_v43 = vpop.xlane.xlu0 %796 }
 0x456   :  { %1749 = vrcp.f32 %v797_v43 }
 0x457   :  { %v812_v47 = vpop.xlane.xlu1 %811 }
 0x458   :  { %1751 = vrcp.f32 %v812_v47 }
 0x459   :  { %v809_v48 = vpop.xlane.xlu0 %808 }
 0x45a   :  { %1753 = vrcp.f32 %v809_v48 }
 0x45d   :  { %v1740_v49 = vpop.eup %1739 }
 0x45e   :  { %v1742_v51 = vpop.eup %1741  ;;  %v1283_v52 = vsel %vm740_vm2, %v1740_v49, 0.0 }
 0x45f   :  { %v1744_v54 = vpop.eup %1743  ;;  %1284 = vadd.xlane.f32.xlu1 %v1283_v52  ;;  %v822_v59 = vmul.f32 %v1742_v51, %v1728_v19  ;;  %v1522_v51 = vld [vmem:[%s2124_s9] ss:$0 sm:$0xff] }
 0x460   :  { %v1746_v55 = vpop.eup %1745  ;;  %v1280_v57 = vsel %vm740_vm2, %v1744_v54, 0.0 }
 0x461   :  { %1281 = vadd.xlane.f32.xlu0 %v1280_v57  ;;  %v821_v34 = vmul.f32 %v1746_v55, %v1730_v20  ;;  %v1748_v58 = vpop.eup %1747 }
 0x462   :  { %v824_v62 = vmul.f32 %v1748_v58, %v1732_v22 }
 0x463   :  { %v1750_v60 = vpop.eup %1749  ;;  %1658 = vmatprep.mubr.msk.f32.mxu1 %vm740_vm2, %v821_v34 }
 0x464   :  { %1659 = vmatmul.mubr.msk.f32.vlgmr.msra.gmra.mxu1 %vm740_vm2, %v822_v59  ;;  %v823_v39 = vmul.f32 %v1750_v60, %v1734_v24 }
 0x465   :  { %1662 = vmatpush3.msra.mxu1 %v1941_v53  ;;  %v1752_v61 = vpop.eup %1751 }
 0x466   :  { %1663 = vmatprep.subr.mxu1 %v1950_v56  ;;  %1665 = vmatprep.mubr.msk.f32.mxu1 %vm740_vm2, %v823_v39  ;;  %v828_v2 = vmul.f32 %v1752_v61, %v1736_v25 }
 0x467   :  { %v1754_v63 = vpop.eup %1753  ;;  %1664 = vmatpush3.msra.mxu1 %v1950_v56 }
 0x468   :  { %1675 = vmatprep.subr.mxu1 %v1941_v53  ;;  %1666 = vmatmul.mubr.msk.f32.vlgmr.msra.gmra.mxu1 %vm740_vm2, %v824_v62  ;;  %v827_v0 = vmul.f32 %v1754_v63, %v1738_v26  ;;  %v1157_v26 = vmul.f32 %v2027_v9, %v1906_v45 }
 0x469   :  { %1676 = vmatpush3.msra.mxu1 %v1941_v53 }
 0x46a   :  { %1677 = vmatprep.subr.mxu1 %v1950_v56  ;;  %1679 = vmatprep.mubr.msk.f32.mxu1 %vm740_vm2, %v827_v0  ;;  %v1164_v35 = vsel %vm393_vm1, %v1157_v26, 0.0 }
 0x46b   :  { %1678 = vmatpush3.msra.mxu1 %v1950_v56 }
 0x46c   :  { %1689 = vmatprep.subr.mxu1 %v1941_v53  ;;  %1680 = vmatmul.mubr.msk.f32.vlgmr.msra.gmra.mxu1 %vm740_vm2, %v828_v2 }
 0x46d   :  { %1690 = vmatpush3.msra.mxu1 %v1941_v53  ;;  %v1381_v53 = vld [vmem:[%s2123_s8 + $0x30] sm:$0xff] }
 0x46e   :  { %1691 = vmatprep.subr.mxu1 %v1950_v56 }
 0x46f   :  { %1692 = vmatpush3.msra.mxu1 %v1950_v56  ;;  %v1380_v56 = vld [vmem:[%s2123_s8 + $0x28] sm:$0xff] }
 0x470   :  { %1696 = vmatprep.subr.mxu1 %v1382_v3 }
 0x4e8   :  { %v1285_v42 = vpop.xlane.xlu1 %1284 }
 0x4e9   :  { %1755 = vrcp.f32 %v1285_v42 }
 0x4ea   :  { %v1282_v5 = vpop.xlane.xlu0 %1281 }
 0x4eb   :  { %1757 = vrcp.f32 %v1282_v5 }
 0x4f6   :  { %v1756_v6 = vpop.eup %1755 }
 0x4f7   :  { %v1289_v10 = vmul.f32 %v1756_v6, %v1740_v49 }
 0x4f8   :  { %v1758_v7 = vpop.eup %1757 }
 0x4f9   :  { %v1288_v8 = vmul.f32 %v1758_v7, %v1744_v54 }
 0x4fb   :  { %1693 = vmatprep.mubr.msk.f32.mxu1 %vm740_vm2, %v1288_v8 }
 0x4fc   :  { %1694 = vmatmul.mubr.msk.f32.vlgmr.msra.gmra.mxu1 %vm740_vm2, %v1289_v10 }
 0x4fd   :  { %1697 = vmatpush3.msra.mxu1 %v1382_v3 }
 0x4fe   :  { %1698 = vmatprep.subr.mxu1 %v1381_v53 }
 0x4ff   :  { %1699 = vmatpush3.msra.mxu1 %v1381_v53 }
 0x500   :  { %1700 = vmatprep.subr.mxu1 %v1380_v56 }
 0x501   :  { %1701 = vmatpush3.msra.mxu1 %v1380_v56 }
 0x502   :  { %1702 = vmatprep.subr.mxu1 %v1379_v11 }
 0x503   :  { %1703 = vmatpush3.msra.mxu1 %v1379_v11 }
 0x504   :  { %1704 = vmatprep.subr.mxu1 %v1378_v12 }
 0x505   :  { %1705 = vmatpush3.msra.mxu1 %v1378_v12 }
 0x506   :  { %1706 = vmatprep.subr.mxu1 %v1377_v13 }
 0x507   :  { %1707 = vmatpush3.msra.mxu1 %v1377_v13 }
 0x508   :  { %1708 = vmatprep.subr.mxu1 %v1376_v14 }
 0x509   :  { %1709 = vmatpush3.msra.mxu1 %v1376_v14 }
 0x50a   :  { %1710 = vmatprep.subr.mxu1 %v1375_v15 }
 0x50b   :  { %1711 = vmatpush3.msra.mxu1 %v1375_v15 }
 0x524   :  { %v1660_v16 = vpop.f32.mrf.mxu1 }
 0x525   :  { %v1154_v24 = vmul.f32 %v1660_v16, %v1873_v31 }
 0x526   :  { %v901_v18 = vpop.f32.mrf.mxu1 }
 0x527   :  { %v1153_v23 = vmul.f32 %v901_v18, %v1873_v31 }
 0x528   :  { %v1667_v19 = vpop.f32.mrf.mxu1 }
 0x529   :  { %v1156_v21 = vmul.f32 %v1667_v19, %v1875_v32  ;;  %v1161_v27 = vsel %vm393_vm1, %v1153_v23, 0.0 }
 0x52a   :  { %v982_v17 = vpop.f32.mrf.mxu1 }
 0x52b   :  { %v1155_v20 = vmul.f32 %v982_v17, %v1875_v32  ;;  %v1169_v25 = vsel %vm393_vm1, %v1156_v21, 0.0  ;;  %v1168_v32 = vsel %vm393_vm1, %v1154_v24, 0.0 }
 0x52c   :  { %v1681_v22 = vpop.f32.mrf.mxu1  ;;  %v1170_v30 = vadd.f32 %v1169_v25, %v1168_v32 }
 0x52d   :  { %v1162_v4 = vsel %vm393_vm1, %v1155_v20, 0.0  ;;  %v1160_v31 = vmul.f32 %v1681_v22, %v1908_v46 }
 0x52e   :  { %v1144_v1 = vpop.f32.mrf.mxu1  ;;  %v1163_v29 = vadd.f32 %v1162_v4, %v1161_v27  ;;  %v1172_v38 = vadd.f32 %v1171_v36, %v1170_v30 }
 0x52f   :  { %v1159_v33 = vmul.f32 %v1144_v1, %v1908_v46  ;;  %v1173_v41 = vsel %vm393_vm1, %v1160_v31, 0.0 }
 0x530   :  { %v1165_v37 = vadd.f32 %v1164_v35, %v1163_v29  ;;  %v1174_v48 = vadd.f32 %v1173_v41, %v1172_v38 }
 0x531   :  { %v1166_v9 = vsel %vm393_vm1, %v1159_v33, 0.0 }
 0x532   :  { %v1167_v43 = vadd.f32 %v1166_v9, %v1165_v37 }
 0x5bc   :  { %v1695_v40 = vpop.f32.mrf.mxu1 }
 0x5bd   :  { %v1372_v45 = vmul.f32 %v1695_v40, %v2007_v50 }
 0x5be   :  { %v1362_v44 = vpop.f32.mrf.mxu1 }
 0x5bf   :  { %v1371_v47 = vmul.f32 %v2007_v50, %v1362_v44  ;;  %v1374_v46 = vadd.f32 %v1372_v45, %v1174_v48 }
 0x5c1   :  { %v1373_v49 = vadd.f32 %v1371_v47, %v1167_v43 }
 0x5c3   :  { %1712 = vmatprep.mubr.msk.f32.mxu1 %vm393_vm1, %v1373_v49 }
 0x5c4   :  { %1713 = vmatmul.mubr.msk.f32.vlgmr.msra.gmra.mxu1 %vm393_vm1, %v1374_v46 }
 0x684   :  { %v1714_v52 = vpop.f32.mrf.mxu1 }
 0x685   :  { %v1468_v54 = vadd.f32 %v1714_v52, %v1522_v51 }
 0x686   :  { %v1462_v55 = vpop.f32.mrf.mxu1 }
 0x687   :  { %1473 = vst.msk [vmem:[%s2125_s10 + $0x8] sm:$0xff] %vm1471_vm3, %v1468_v54  ;;  %v1463_v50 = vadd.f32 %v1522_v51, %v1462_v55 }
 0x689   :  { %1472 = vst.msk [vmem:[%s2125_s10] sm:$0xff] %vm1471_vm3, %v1463_v50 }
 0x68a   :  { %1478 = vsyncpa [#allocation3], 1 }

</bundles_post_ra>
